<compile_context>
chip_gen: v7x
topology: tpu7x:2x2x1
jax: 0.10.0
libtpu: 0.0.40
codegen_flags: <defaults>
</compile_context>

<pallas_src>
import functools

import jax
import jax.numpy as jnp
from jax.experimental import pallas as pl
from jax.experimental.pallas import tpu as pltpu


def _round_up(x, m):
    return (x + m - 1) // m * m


@functools.lru_cache(maxsize=1)
def _vmem_limit_bytes():
    # ~75% of physical VMEM: ~48 MiB on v7x (64 MiB/TC), ~96 MiB on v5e/v6e
    # (128 MiB).  Never request the entire physical VMEM.
    try:
        return int(pltpu.get_tpu_info().vmem_capacity_bytes) * 3 // 4
    except Exception:
        return 48 * 1024 * 1024


# ------------------------------ exact GELU ------------------------------------
def _erf_poly(x):
    # Abramowitz & Stegun 7.1.26 polynomial erf (|err| < 1.5e-7). Built only
    # from abs/exp/mul/add/where so it always lowers on Mosaic.
    a1, a2, a3, a4, a5 = 0.254829592, -0.284496736, 1.421413741, -1.453152027, 1.061405429
    p = 0.3275911
    sgn = jnp.where(x >= 0.0, 1.0, -1.0)
    ax = jnp.abs(x)
    t = 1.0 / (1.0 + p * ax)
    poly = ((((a5 * t + a4) * t + a3) * t + a2) * t + a1) * t
    return sgn * (1.0 - poly * jnp.exp(-ax * ax))


def _gelu_exact(x):
    # Exact (erf-based) GELU, matching PyTorch nn.GELU().
    return 0.5 * x * (1.0 + _erf_poly(x * 0.7071067811865476))


# --------------- Linear (+fused LayerNorm / GELU / residual) ------------------
def _linear_kernel(*refs, activation, has_residual, has_ln, use_bf16, ln_eps):
    it = iter(refs)
    x_ref, w_ref, b_ref = next(it), next(it), next(it)
    g_ref = next(it) if has_ln else None
    beta_ref = next(it) if has_ln else None
    r_ref = next(it) if has_residual else None
    o_ref, acc_ref = next(it), next(it)

    @pl.when(pl.program_id(2) == 0)
    def _():
        acc_ref[...] = jnp.zeros_like(acc_ref)

    x = x_ref[...]
    if has_ln:  # the full K row lives in this tile (enforced by the wrapper)
        xf = x.astype(jnp.float32)
        mu = jnp.mean(xf, axis=-1, keepdims=True)
        xc = xf - mu
        var = jnp.mean(xc * xc, axis=-1, keepdims=True)
        x = (xc * jax.lax.rsqrt(var + ln_eps) * g_ref[...].astype(jnp.float32)
             + beta_ref[...].astype(jnp.float32))
    w = w_ref[...]
    if use_bf16:  # bf16 MXU operands, f32 accumulation (v6e/v7x fast path)
        x = x.astype(jnp.bfloat16)
        w = w.astype(jnp.bfloat16)
    acc_ref[...] += jnp.dot(x, w, preferred_element_type=jnp.float32)

    @pl.when(pl.program_id(2) == pl.num_programs(2) - 1)
    def _():
        y = acc_ref[...] + b_ref[...].astype(jnp.float32)
        if activation == "gelu":
            y = _gelu_exact(y)
        if has_residual:
            y = y + r_ref[...].astype(jnp.float32)
        o_ref[...] = y.astype(o_ref.dtype)


def linear(x, w, b=None, *, activation=None, residual=None, ln=None,
           ln_eps=1e-5, use_bf16_mxu=False):
    """y = act(LN?(x) @ w + b) (+ residual). x: (M, K), w: (K, N)."""
    M, K = x.shape
    Kw, N = w.shape
    assert K == Kw
    out_dtype = x.dtype
    has_ln = ln is not None
    has_residual = residual is not None

    tm = min(512, _round_up(M, 8))
    tn = min(256, _round_up(N, 128))
    # LayerNorm fusion needs the whole contraction axis in one unpadded tile.
    tk = K if has_ln else min(512, _round_up(K, 128))
    Mp, Np, Kp = _round_up(M, tm), _round_up(N, tn), _round_up(K, tk)

    xp = jnp.pad(x, ((0, Mp - M), (0, Kp - K))) if (Mp, Kp) != (M, K) else x
    wp = jnp.pad(w, ((0, Kp - K), (0, Np - N))) if (Kp, Np) != (K, N) else w
    if b is None:
        bp = jnp.zeros((1, Np), dtype=jnp.float32)
    else:
        bp = jnp.pad(b.reshape(1, N).astype(jnp.float32), ((0, 0), (0, Np - N)))

    inputs = [xp, wp, bp]
    in_specs = [
        pl.BlockSpec((tm, tk), lambda i, j, k: (i, k)),
        pl.BlockSpec((tk, tn), lambda i, j, k: (k, j)),
        pl.BlockSpec((1, tn), lambda i, j, k: (0, j)),
    ]
    if has_ln:
        gamma, beta = ln
        inputs += [gamma.reshape(1, K).astype(jnp.float32),
                   beta.reshape(1, K).astype(jnp.float32)]
        in_specs += [pl.BlockSpec((1, K), lambda i, j, k: (0, 0)),
                     pl.BlockSpec((1, K), lambda i, j, k: (0, 0))]
    if has_residual:
        rp = (jnp.pad(residual, ((0, Mp - M), (0, Np - N)))
              if (Mp, Np) != (M, N) else residual)
        inputs.append(rp)
        in_specs.append(pl.BlockSpec((tm, tn), lambda i, j, k: (i, j)))

    bytes_accessed = (Mp * Kp + Kp * Np + Mp * Np * (2 if has_residual else 1)
                      + Np) * x.dtype.itemsize
    cost = pl.CostEstimate(
        flops=2 * Mp * Np * Kp + (8 * Mp * Kp if has_ln else 0),
        transcendentals=Mp * Np if activation == "gelu" else 0,
        bytes_accessed=bytes_accessed,
    )

    out = pl.pallas_call(
        functools.partial(_linear_kernel, activation=activation,
                          has_residual=has_residual, has_ln=has_ln,
                          use_bf16=use_bf16_mxu, ln_eps=ln_eps),
        out_shape=jax.ShapeDtypeStruct((Mp, Np), out_dtype),
        grid_spec=pltpu.PrefetchScalarGridSpec(
            num_scalar_prefetch=0,
            grid=(Mp // tm, Np // tn, Kp // tk),
            in_specs=in_specs,
            out_specs=pl.BlockSpec((tm, tn), lambda i, j, k: (i, j)),
            scratch_shapes=[pltpu.VMEM((tm, tn), jnp.float32)],
        ),
        compiler_params=pltpu.CompilerParams(
            dimension_semantics=("parallel", "parallel", "arbitrary"),
            vmem_limit_bytes=_vmem_limit_bytes(),
        ),
        cost_estimate=cost,
    )(*inputs)
    return out[:M, :N]


# ------------------------- Linear attention core ------------------------------
def _linattn_kernel(q_ref, k_ref, v_ref, o_ref, *, n_heads, head_dim, s_valid, eps):
    q = q_ref[...].astype(jnp.float32)          # (Sp, D), heads packed on lanes
    k = k_ref[...].astype(jnp.float32)
    v = v_ref[...].astype(jnp.float32)
    s_pad = q.shape[0]

    def elu_p1(u):  # elu(u) + 1  (== exp(u) for u <= 0)
        return jnp.where(u > 0, u + 1.0, jnp.exp(jnp.minimum(u, 0.0)))

    if s_pad != s_valid:  # zero feature-map rows that come from sequence padding
        row = jax.lax.broadcasted_iota(jnp.int32, (s_pad, 1), 0)
        kmask = (row < s_valid).astype(jnp.float32)
    else:
        kmask = None

    dn = (((0,), (0,)), ((), ()))               # contract the sequence axis
    outs = []
    for h in range(n_heads):        # static unroll; one DMA'd block serves all heads
        sl = slice(h * head_dim, (h + 1) * head_dim)
        qh, kh, vh = q[:, sl], k[:, sl], v[:, sl]
        qp, qm = elu_p1(qh), elu_p1(-qh)        # two halves of the feature map
        kp, km = elu_p1(kh), elu_p1(-kh)
        if kmask is not None:
            kp, km = kp * kmask, km * kmask
        kv_p = jax.lax.dot_general(kp, vh, dn, preferred_element_type=jnp.float32)
        kv_m = jax.lax.dot_general(km, vh, dn, preferred_element_type=jnp.float32)
        num = (jnp.dot(qp, kv_p, preferred_element_type=jnp.float32)
               + jnp.dot(qm, kv_m, preferred_element_type=jnp.float32))
        ks_p = jnp.sum(kp, axis=0, keepdims=True)
        ks_m = jnp.sum(km, axis=0, keepdims=True)
        denom = (jnp.sum(qp * ks_p, axis=-1, keepdims=True)
                 + jnp.sum(qm * ks_m, axis=-1, keepdims=True) + eps)
        # approx=False keeps the division tight vs the f32 reference; flip to
        # True if the extra EUP throughput matters more than the last ~1e-3.
        outs.append(num * pl.reciprocal(denom, approx=False))
    o_ref[...] = jnp.concatenate(outs, axis=-1).astype(o_ref.dtype)


def linear_attention(q, k, v, n_heads, eps=1e-6):
    """q, k, v: (B, S, D) with heads packed along the last (lane) axis."""
    B, S, D = q.shape
    head_dim = D // n_heads
    Sp = _round_up(S, 8)
    if Sp != S:
        pad = ((0, 0), (0, Sp - S), (0, 0))
        q, k, v = jnp.pad(q, pad), jnp.pad(k, pad), jnp.pad(v, pad)
    # TODO(synk): for very long sequences, chunk S (two-pass kv accumulation in
    # VMEM scratch) so the per-batch working set stays under v7x's 64 MiB VMEM.

    def spec():
        return pl.BlockSpec((None, Sp, D), lambda b: (b, 0, 0))

    cost = pl.CostEstimate(
        flops=8 * B * n_heads * Sp * head_dim * head_dim,
        transcendentals=4 * B * Sp * D,
        bytes_accessed=4 * B * Sp * D * q.dtype.itemsize,
    )
    out = pl.pallas_call(
        functools.partial(_linattn_kernel, n_heads=n_heads, head_dim=head_dim,
                          s_valid=S, eps=eps),
        out_shape=jax.ShapeDtypeStruct((B, Sp, D), q.dtype),
        grid_spec=pltpu.PrefetchScalarGridSpec(
            num_scalar_prefetch=0,
            grid=(B,),
            in_specs=[spec(), spec(), spec()],
            out_specs=spec(),
        ),
        compiler_params=pltpu.CompilerParams(
            dimension_semantics=("parallel",),
            vmem_limit_bytes=_vmem_limit_bytes(),
        ),
        cost_estimate=cost,
    )(q, k, v)
    return out[:, :S, :] if Sp != S else out


# ----------------------------- Full block -------------------------------------
def linear_attention_block(x, params, use_bf16_mxu=True):
    B, S, D = x.shape
    H = params["n_heads"]
    x2 = x.reshape(B * S, D)

    # q uses ln1(x) (LayerNorm fused into the matmul prologue); k, v use raw x.
    q = linear(x2, params["wq"], ln=(params["ln1_w"], params["ln1_b"]),
               use_bf16_mxu=use_bf16_mxu)
    w_kv = params.get("w_kv")
    if w_kv is None:  # prefer the pre-fused (hoisted) weight in params
        w_kv = jnp.concatenate([params["wk"], params["wv"]], axis=1)
    kv = linear(x2, w_kv, use_bf16_mxu=use_bf16_mxu)
    k, v = kv[:, :D], kv[:, D:]

    # Head-packed attention: no head split/merge transposes, lane-dense output.
    attn = linear_attention(q.reshape(B, S, D), k.reshape(B, S, D),
                            v.reshape(B, S, D), H)
    attn2 = attn.reshape(B * S, D)

    # x1 = x + o_proj(attn); residual fused into the matmul epilogue.
    x1 = linear(attn2, params["wo"], residual=x2, use_bf16_mxu=use_bf16_mxu)

    # out = x1 + mlp(ln2(x1)); LN2, GELU and residuals fused into the matmuls.
    m = linear(x1, params["w_mlp1"], params["b_mlp1"], activation="gelu",
               ln=(params["ln2_w"], params["ln2_b"]), use_bf16_mxu=use_bf16_mxu)
    out = linear(m, params["w_mlp2"], params["b_mlp2"], residual=x1,
                 use_bf16_mxu=use_bf16_mxu)
    return out.reshape(B, S, D)


# ----------------------------- Pure-JAX reference ------------------------------
def linear_attention_block_ref(x, params):
    B, S, D = x.shape
    H = params["n_heads"]
    hd = D // H
    hp = jax.lax.Precision.HIGHEST

    def ln(t, w, b, eps=1e-5):
        mu = jnp.mean(t, axis=-1, keepdims=True)
        var = jnp.mean((t - mu) ** 2, axis=-1, keepdims=True)
        return (t - mu) * jax.lax.rsqrt(var + eps) * w + b

    def fmap(t):
        return jnp.concatenate([jax.nn.elu(t) + 1.0, jax.nn.elu(-t) + 1.0], axis=-1)

    h1 = ln(x, params["ln1_w"], params["ln1_b"])
    q = jnp.einsum("bsd,de->bse", h1, params["wq"], precision=hp).reshape(B, S, H, hd)
    k = jnp.einsum("bsd,de->bse", x, params["wk"], precision=hp).reshape(B, S, H, hd)
    v = jnp.einsum("bsd,de->bse", x, params["wv"], precision=hp).reshape(B, S, H, hd)
    qf, kf = fmap(q), fmap(k)
    kv = jnp.einsum("bshd,bshv->bhdv", kf, v, precision=hp)
    qkv = jnp.einsum("bqhd,bhdv->bqhv", qf, kv, precision=hp)
    k_sum = kf.sum(axis=1, keepdims=True)
    qk_sum = jnp.einsum("bqhd,bshd->bqh", qf, k_sum, precision=hp)
    attn = (qkv / (qk_sum[..., None] + 1e-6)).reshape(B, S, D)
    x1 = x + jnp.einsum("bsd,de->bse", attn, params["wo"], precision=hp)
    h2 = ln(x1, params["ln2_w"], params["ln2_b"])
    m = jax.nn.gelu(jnp.einsum("bsd,de->bse", h2, params["w_mlp1"], precision=hp)
                    + params["b_mlp1"], approximate=False)
    m = jnp.einsum("bse,ed->bsd", m, params["w_mlp2"], precision=hp) + params["b_mlp2"]
    return x1 + m


if __name__ == "__main__":
    key = jax.random.PRNGKey(0)
    B, S, D, H = 2, 16, 128, 4          # head_dim=32, feature dim per head = 64
    ks = jax.random.split(key, 12)
    x = jax.random.normal(ks[0], (B, S, D), dtype=jnp.float32)
    params = {
        "n_heads": H,
        "wq": jax.random.normal(ks[1], (D, D), jnp.float32) * (D ** -0.5),
        "wk": jax.random.normal(ks[2], (D, D), jnp.float32) * (D ** -0.5),
        "wv": jax.random.normal(ks[3], (D, D), jnp.float32) * (D ** -0.5),
        "wo": jax.random.normal(ks[4], (D, D), jnp.float32) * (D ** -0.5),
        "ln1_w": 1.0 + 0.1 * jax.random.normal(ks[5], (D,), jnp.float32),
        "ln1_b": 0.1 * jax.random.normal(ks[6], (D,), jnp.float32),
        "ln2_w": 1.0 + 0.1 * jax.random.normal(ks[7], (D,), jnp.float32),
        "ln2_b": 0.1 * jax.random.normal(ks[8], (D,), jnp.float32),
        "w_mlp1": jax.random.normal(ks[9], (D, 4 * D), jnp.float32) * (D ** -0.5),
        "b_mlp1": 0.02 * jax.random.normal(ks[10], (4 * D,), jnp.float32),
        "w_mlp2": jax.random.normal(ks[11], (4 * D, D), jnp.float32) * ((4 * D) ** -0.5),
        "b_mlp2": jnp.zeros((D,), jnp.float32),
    }
    # Hoisted fused k|v projection weight (avoids a concat per forward pass).
    params["w_kv"] = jnp.concatenate([params["wk"], params["wv"]], axis=1)

    ref = linear_attention_block_ref(x, params)

    # f32-MXU path: tight tolerance against the HIGHEST-precision reference.
    out = jax.block_until_ready(linear_attention_block(x, params, use_bf16_mxu=False))
    assert out.shape == x.shape and out.dtype == x.dtype
    err_f32 = float(jnp.max(jnp.abs(out - ref)))
    assert jnp.allclose(out, ref, atol=2e-3, rtol=2e-3), f"f32 max abs err {err_f32}"

    # bf16-MXU-operand fast path (v6e/v7x): looser tolerance, f32 accumulation.
    out_bf = jax.block_until_ready(linear_attention_block(x, params, use_bf16_mxu=True))
    err_bf = float(jnp.max(jnp.abs(out_bf - ref)))
    assert jnp.allclose(out_bf, ref, atol=6e-2, rtol=6e-2), f"bf16 max abs err {err_bf}"

    print("KERNEL_OK")
</pallas_src>

<mosaic_0001>
module attributes {stable_mosaic.version = 11 : i64} {
  func.func @_linear_kernel(%arg0: i32, %arg1: i32, %arg2: i32, %arg3: memref<32x128xf32, #tpu.memory_space<vmem>>, %arg4: memref<128x128xf32, #tpu.memory_space<vmem>>, %arg5: memref<1x128xf32, #tpu.memory_space<vmem>>, %arg6: memref<1x128xf32, #tpu.memory_space<vmem>>, %arg7: memref<1x128xf32, #tpu.memory_space<vmem>>, %arg8: memref<32x128xf32, #tpu.memory_space<vmem>>, %arg9: memref<32x128xf32, #tpu.memory_space<vmem>>) attributes {dimension_semantics = [#tpu.dimension_semantics<parallel>, #tpu.dimension_semantics<parallel>, #tpu.dimension_semantics<arbitrary>], iteration_bounds = array<i64: 1, 1, 1>, scalar_prefetch = 0 : i64, scratch_operands = 1 : i64, tpu.core_type = #tpu.core_type<tc>, window_params = [{transform_indices = @transform_0, window_bounds = array<i64: 32, 128>}, {transform_indices = @transform_1, window_bounds = array<i64: 128, 128>}, {transform_indices = @transform_2, window_bounds = array<i64: 1, 128>}, {pipeline_mode = #tpu.pipeline_mode<synchronous>, transform_indices = @transform_3, window_bounds = array<i64: 1, 128>}, {pipeline_mode = #tpu.pipeline_mode<synchronous>, transform_indices = @transform_4, window_bounds = array<i64: 1, 128>}, {transform_indices = @transform_5, window_bounds = array<i64: 32, 128>}]} {
    %c0_i32 = arith.constant 0 : i32
    %0 = arith.cmpi eq, %arg2, %c0_i32 : i32
    %1 = arith.extui %0 : i1 to i32
    %c0_i32_0 = arith.constant 0 : i32
    %2 = arith.cmpi ne, %1, %c0_i32_0 : i32
    scf.if %2 {
      %cst_19 = arith.constant 0.000000e+00 : f32
      %34 = vector.broadcast %cst_19 : f32 to vector<32x128xf32>
      %c0_20 = arith.constant 0 : index
      %c0_21 = arith.constant 0 : index
      %35 = vector.load %arg9[%c0_20, %c0_21] : memref<32x128xf32, #tpu.memory_space<vmem>>, vector<32x128xf32>
      tpu.vector_store %arg9[%c0_20, %c0_21], %34 {strides = array<i32>} : memref<32x128xf32, #tpu.memory_space<vmem>>, vector<32x128xf32>,
    } else {
    }
    %c0 = arith.constant 0 : index
    %c0_1 = arith.constant 0 : index
    %3 = vector.load %arg3[%c0, %c0_1] : memref<32x128xf32, #tpu.memory_space<vmem>>, vector<32x128xf32>
    %cst = arith.constant dense<0.000000e+00> : vector<32xf32>
    %4 = vector.multi_reduction <add>, %3, %cst [1] : vector<32x128xf32> to vector<32xf32>
    %5 = vector.shape_cast %4 : vector<32xf32> to vector<32x1xf32>
    %cst_2 = arith.constant 1.280000e+02 : f32
    %6 = vector.broadcast %cst_2 : f32 to vector<32x1xf32>
    %7 = arith.divf %5, %6 : vector<32x1xf32>
    %8 = vector.broadcast %7 : vector<32x1xf32> to vector<32x128xf32>
    %9 = arith.subf %3, %8 : vector<32x128xf32>
    %10 = arith.mulf %9, %9 : vector<32x128xf32>
    %cst_3 = arith.constant dense<0.000000e+00> : vector<32xf32>
    %11 = vector.multi_reduction <add>, %10, %cst_3 [1] : vector<32x128xf32> to vector<32xf32>
    %12 = vector.shape_cast %11 : vector<32xf32> to vector<32x1xf32>
    %cst_4 = arith.constant 1.280000e+02 : f32
    %13 = vector.broadcast %cst_4 : f32 to vector<32x1xf32>
    %14 = arith.divf %12, %13 : vector<32x1xf32>
    %cst_5 = arith.constant 9.99999974E-6 : f32
    %15 = vector.broadcast %cst_5 : f32 to vector<32x1xf32>
    %16 = arith.addf %14, %15 : vector<32x1xf32>
    %17 = math.rsqrt %16 : vector<32x1xf32>
    %18 = vector.broadcast %17 : vector<32x1xf32> to vector<32x128xf32>
    %19 = arith.mulf %9, %18 : vector<32x128xf32>
    %c0_6 = arith.constant 0 : index
    %c0_7 = arith.constant 0 : index
    %20 = vector.load %arg6[%c0_6, %c0_7] : memref<1x128xf32, #tpu.memory_space<vmem>>, vector<1x128xf32>
    %21 = vector.broadcast %20 : vector<1x128xf32> to vector<32x128xf32>
    %22 = arith.mulf %19, %21 : vector<32x128xf32>
    %c0_8 = arith.constant 0 : index
    %c0_9 = arith.constant 0 : index
    %23 = vector.load %arg7[%c0_8, %c0_9] : memref<1x128xf32, #tpu.memory_space<vmem>>, vector<1x128xf32>
    %24 = vector.broadcast %23 : vector<1x128xf32> to vector<32x128xf32>
    %25 = arith.addf %22, %24 : vector<32x128xf32>
    %c0_10 = arith.constant 0 : index
    %c0_11 = arith.constant 0 : index
    %26 = vector.load %arg4[%c0_10, %c0_11] : memref<128x128xf32, #tpu.memory_space<vmem>>, vector<128x128xf32>
    %c0_12 = arith.constant 0 : index
    %c0_13 = arith.constant 0 : index
    %27 = vector.load %arg9[%c0_12, %c0_13] : memref<32x128xf32, #tpu.memory_space<vmem>>, vector<32x128xf32>
    %cst_14 = arith.constant dense<0.000000e+00> : vector<32x128xf32>
    %28 = tpu.matmul %25, %26, %cst_14 {dimension_numbers = #tpu.dot_dimension_numbers<[1], [0], [0], [1], [0, 0, 1, 1], [], []>} : vector<32x128xf32>, vector<128x128xf32>, vector<32x128xf32> -> vector<32x128xf32>
    %29 = arith.addf %27, %28 : vector<32x128xf32>
    %c0_15 = arith.constant 0 : index
    %c0_16 = arith.constant 0 : index
    %30 = vector.load %arg9[%c0_15, %c0_16] : memref<32x128xf32, #tpu.memory_space<vmem>>, vector<32x128xf32>
    tpu.vector_store %arg9[%c0_15, %c0_16], %29 {strides = array<i32>} : memref<32x128xf32, #tpu.memory_space<vmem>>, vector<32x128xf32>,
    %c0_i32_17 = arith.constant 0 : i32
    %31 = arith.cmpi eq, %arg2, %c0_i32_17 : i32
    %32 = arith.extui %31 : i1 to i32
    %c0_i32_18 = arith.constant 0 : i32
    %33 = arith.cmpi ne, %32, %c0_i32_18 : i32
    scf.if %33 {
      %c0_19 = arith.constant 0 : index
      %c0_20 = arith.constant 0 : index
      %34 = vector.load %arg9[%c0_19, %c0_20] : memref<32x128xf32, #tpu.memory_space<vmem>>, vector<32x128xf32>
      %c0_21 = arith.constant 0 : index
      %c0_22 = arith.constant 0 : index
      %35 = vector.load %arg5[%c0_21, %c0_22] : memref<1x128xf32, #tpu.memory_space<vmem>>, vector<1x128xf32>
      %36 = vector.broadcast %35 : vector<1x128xf32> to vector<32x128xf32>
      %37 = arith.addf %34, %36 : vector<32x128xf32>
      %c0_23 = arith.constant 0 : index
      %c0_24 = arith.constant 0 : index
      %38 = vector.load %arg8[%c0_23, %c0_24] : memref<32x128xf32, #tpu.memory_space<vmem>>, vector<32x128xf32>
      tpu.vector_store %arg8[%c0_23, %c0_24], %37 {strides = array<i32>} : memref<32x128xf32, #tpu.memory_space<vmem>>, vector<32x128xf32>,
    } else {
    }
    return
  }
  func.func @transform_0(%arg0: i32, %arg1: i32, %arg2: i32) -> (i32, i32) {
    %c0_i32 = arith.constant 0 : i32
    return %arg0, %arg2 : i32, i32
  }
  func.func @transform_1(%arg0: i32, %arg1: i32, %arg2: i32) -> (i32, i32) {
    %c0_i32 = arith.constant 0 : i32
    return %arg2, %arg1 : i32, i32
  }
  func.func @transform_2(%arg0: i32, %arg1: i32, %arg2: i32) -> (i32, i32) {
    %c0_i32 = arith.constant 0 : i32
    %c0_i32_0 = arith.constant 0 : i32
    return %c0_i32, %arg1 : i32, i32
  }
  func.func @transform_3(%arg0: i32, %arg1: i32, %arg2: i32) -> (i32, i32) {
    %c0_i32 = arith.constant 0 : i32
    %c0_i32_0 = arith.constant 0 : i32
    %c0_i32_1 = arith.constant 0 : i32
    return %c0_i32, %c0_i32_0 : i32, i32
  }
  func.func @transform_4(%arg0: i32, %arg1: i32, %arg2: i32) -> (i32, i32) {
    %c0_i32 = arith.constant 0 : i32
    %c0_i32_0 = arith.constant 0 : i32
    %c0_i32_1 = arith.constant 0 : i32
    return %c0_i32, %c0_i32_0 : i32, i32
  }
  func.func @transform_5(%arg0: i32, %arg1: i32, %arg2: i32) -> (i32, i32) {
    %c0_i32 = arith.constant 0 : i32
    return %arg0, %arg1 : i32, i32
  }
}

</mosaic_0001>

<bundles_post_ra>
// kernel: tpu_custom_call.1
= control target key start
LH: loop header
LB: loop body
LE: loop exit
PB: predicated region body
PF: predicated region fallthrough
CT: control target
= control target key end

     0   :  { %10 = vsyncpa [#allocation4], 0  ;;  %s584_s0 = inlined_call_operand.hbm [shape: f32[32,128], index: 0, kind: input, shape index: {}]   ;;  %s585_s1 = inlined_call_operand.hbm [shape: f32[128,128], index: 1, kind: input, shape index: {}]   ;;  %s586_s2 = inlined_call_operand.vmem [shape: f32[1,128], index: 2, kind: input, shape index: {}]   ;;  %s587_s3 = inlined_call_operand.vmem [shape: f32[1,128], index: 3, kind: input, shape index: {}]   ;;  %s588_s4 = inlined_call_operand.vmem [shape: f32[1,128], index: 4, kind: input, shape index: {}]   ;;  %s589_s5 = inlined_call_operand.hbm [shape: f32[32,128], index: 5, kind: output, shape index: {}]  }
   0x1   :  { %11 = vsyncpa [#allocation7], 0 }
   0x2   :  { %12 = vsyncpa [#allocation5], 0  ;;  %s475_s18 = smov [#allocation3]   ;;  %s403_s22 = scalar_lea.hbm %s584_s0, 512 }
   0x3   :  { %s18_s19 = sshll.u32 %s475_s18, 4  ;;  %p404_p0 = scmp.ne.s32.totalorder %s584_s0, %s403_s22  ;;  %s19_s19 = int_to_ptr.vmem [resolvable:$true] %s18_s19 }
   0x4   :  { %p407_p1 = scmp.lt.u32.totalorder %s403_s22, %s584_s0 }
   0x6   :  { %p409_p2 = pnand %p407_p1, %p404_p0 }
   0x8   :  { %412 = shalt.err (!%p409_p2)
}
   0x9   :  { %s413_s27 = scalar_lea.vmem %s19_s19, 512  ;;  %p418_p4 = scmp.lt.s32.totalorder %s19_s19, %s19_s19 }
   0xa   :  { %p414_p3 = scmp.ne.s32.totalorder %s19_s19, %s413_s27  ;;  %p419_p5 = scmp.lt.s32.totalorder %s413_s27, %s413_s27 }
   0xc   :  { %p420_p6 = por %p419_p5, %p418_p4 }
   0xe   :  { %p421_p7 = pnand %p420_p6, %p414_p3 }
  0x10   :  { %424 = shalt.err (!%p421_p7)
}
  0x11   :  { %s476_s28 = smov 128   ;;  %s477_s29 = smov 8  }
  0x12   :  { %24 = dma.hbm_to_vmem [thread:$0]  %s584_s0, 512, %s19_s19, [#allocation4], %s476_s28, %s476_s28, %s477_s29  }
  0x13   :  { %s478_s7 = smov [#allocation6]   ;;  %s425_s11 = scalar_lea.hbm %s585_s1, 2048 }
  0x14   :  { %s30_s8 = sshll.u32 %s478_s7, 4  ;;  %p426_p8 = scmp.ne.s32.totalorder %s585_s1, %s425_s11  ;;  %s31_s8 = int_to_ptr.vmem [resolvable:$true] %s30_s8 }
  0x15   :  { %p429_p9 = scmp.lt.u32.totalorder %s425_s11, %s585_s1 }
  0x17   :  { %p431_p10 = pnand %p429_p9, %p426_p8 }
  0x19   :  { %434 = shalt.err (!%p431_p10)
}
  0x1a   :  { %s435_s16 = scalar_lea.vmem %s31_s8, 2048  ;;  %p440_p12 = scmp.lt.s32.totalorder %s31_s8, %s31_s8 }
  0x1b   :  { %p436_p11 = scmp.ne.s32.totalorder %s31_s8, %s435_s16  ;;  %p441_p13 = scmp.lt.s32.totalorder %s435_s16, %s435_s16 }
  0x1d   :  { %p442_p0 = por %p441_p13, %p440_p12 }
  0x1f   :  { %p443_p1 = pnand %p442_p0, %p436_p11 }
  0x21   :  { %446 = shalt.err (!%p443_p1)
}
  0x22   :  { %36 = dma.hbm_to_vmem [thread:$0]  %s585_s1, 2048, %s31_s8, [#allocation7], %s476_s28, %s476_s28, %s477_s29  }
  0x23   :  { %469 = dma.done.wait [#allocation4], 512  }
  0x24   :  { %470 = vsyncadd [#allocation4], 4294966784 }
  0x25   :  { %471 = dma.done.wait [#allocation7], 2048  }
  0x26   :  { %472 = vsyncadd [#allocation7], 4294965248  ;;  %v57_v0 = vld [vmem:[#allocation3] sm:$0xff]  ;;  %v58_v1 = vld [vmem:[#allocation3 + $0x8] sm:$0xff]  ;;  %s479_s21 = smov [#allocation8]  }
  0x27   :  { %61 = vadd.xlane.f32.xlu0 %v57_v0  ;;  %63 = vadd.xlane.f32.xlu1 %v58_v1  ;;  %v59_v2 = vld [vmem:[#allocation3 + $0x10] sm:$0xff]  ;;  %v60_v3 = vld [vmem:[#allocation3 + $0x18] sm:$0xff]  ;;  %v128_v4 = vld [vmem:[#allocation6] sm:$0xff]  ;;  %s268_s22 = sshll.u32 %s479_s21, 4  ;;  %s269_s22 = int_to_ptr.vmem [resolvable:$true] %s268_s22 }
  0x28   :  { %v129_v5 = vld [vmem:[#allocation6 + $0x8] sm:$0xff]  ;;  %v130_v6 = vld [vmem:[#allocation6 + $0x10] sm:$0xff]  ;;  %v131_v8 = vld [vmem:[#allocation6 + $0x18] sm:$0xff]  ;;  %s447_s23 = scalar_lea.vmem %s269_s22, 512  ;;  %p452_p3 = scmp.lt.s32.totalorder %s269_s22, %s269_s22 }
  0x29   :  { %v342_v7 = vpack.c.bf16 %v129_v5, %v128_v4  ;;  %v346_v9 = vpack.c.bf16 %v131_v8, %v130_v6  ;;  %v132_v26 = vld [vmem:[#allocation6 + $0x20] sm:$0xff]  ;;  %v133_v27 = vld [vmem:[#allocation6 + $0x28] sm:$0xff]  ;;  %v134_v29 = vld [vmem:[#allocation6 + $0x30] sm:$0xff]  ;;  %p448_p2 = scmp.ne.s32.totalorder %s269_s22, %s447_s23  ;;  %p453_p4 = scmp.lt.s32.totalorder %s447_s23, %s447_s23 }
  0x2a   :  { %v350_v28 = vpack.c.bf16 %v133_v27, %v132_v26  ;;  %v135_v30 = vld [vmem:[#allocation6 + $0x38] sm:$0xff]  ;;  %v136_v32 = vld [vmem:[#allocation6 + $0x40] sm:$0xff]  ;;  %v137_v33 = vld [vmem:[#allocation6 + $0x48] sm:$0xff] }
  0x2b   :  { %65 = vadd.xlane.f32.xlu0 %v59_v2  ;;  %67 = vadd.xlane.f32.xlu1 %v60_v3  ;;  %v354_v31 = vpack.c.bf16 %v135_v30, %v134_v29  ;;  %v358_v34 = vpack.c.bf16 %v137_v33, %v136_v32  ;;  %v138_v35 = vld [vmem:[#allocation6 + $0x50] sm:$0xff]  ;;  %v139_v36 = vld [vmem:[#allocation6 + $0x58] sm:$0xff]  ;;  %v140_v38 = vld [vmem:[#allocation6 + $0x60] sm:$0xff]  ;;  %p454_p5 = por %p453_p4, %p452_p3 }
  0x2c   :  { %343 = vmatprep.subr.bf16.mxu0 %v342_v7  ;;  %374 = vmatprep.subr.bf16.mxu1 %v342_v7  ;;  %v362_v37 = vpack.c.bf16 %v139_v36, %v138_v35  ;;  %v141_v39 = vld [vmem:[#allocation6 + $0x68] sm:$0xff]  ;;  %v142_v41 = vld [vmem:[#allocation6 + $0x70] sm:$0xff]  ;;  %v143_v42 = vld [vmem:[#allocation6 + $0x78] sm:$0xff] }
  0x2d   :  { %345 = vmatpush3.bf16.msra.mxu0 %v342_v7  ;;  %382 = vmatpush3.bf16.msra.mxu1 %v342_v7  ;;  %v366_v40 = vpack.c.bf16 %v141_v39, %v140_v38  ;;  %v370_v43 = vpack.c.bf16 %v143_v42, %v142_v41  ;;  %v281_v57 = vld [vmem:[%s587_s3] ss:$0 sm:$0xff]  ;;  %p455_p6 = pnand %p454_p5, %p448_p2 }
  0x2e   :  { %347 = vmatprep.subr.bf16.mxu0 %v346_v9  ;;  %375 = vmatprep.subr.bf16.mxu1 %v346_v9  ;;  %v282_v59 = vld [vmem:[%s588_s4] ss:$0 sm:$0xff] }
  0x31   :  { %349 = vmatpush3.bf16.msra.mxu0 %v346_v9  ;;  %383 = vmatpush3.bf16.msra.mxu1 %v346_v9 }
  0x32   :  { %351 = vmatprep.subr.bf16.mxu0 %v350_v28  ;;  %376 = vmatprep.subr.bf16.mxu1 %v350_v28 }
  0x35   :  { %353 = vmatpush3.bf16.msra.mxu0 %v350_v28  ;;  %384 = vmatpush3.bf16.msra.mxu1 %v350_v28 }
  0x36   :  { %355 = vmatprep.subr.bf16.mxu0 %v354_v31  ;;  %377 = vmatprep.subr.bf16.mxu1 %v354_v31 }
  0x39   :  { %357 = vmatpush3.bf16.msra.mxu0 %v354_v31  ;;  %385 = vmatpush3.bf16.msra.mxu1 %v354_v31 }
  0x3a   :  { %359 = vmatprep.subr.bf16.mxu0 %v358_v34  ;;  %378 = vmatprep.subr.bf16.mxu1 %v358_v34 }
  0x3d   :  { %361 = vmatpush3.bf16.msra.mxu0 %v358_v34  ;;  %386 = vmatpush3.bf16.msra.mxu1 %v358_v34 }
  0x3e   :  { %363 = vmatprep.subr.bf16.mxu0 %v362_v37  ;;  %379 = vmatprep.subr.bf16.mxu1 %v362_v37 }
  0x41   :  { %365 = vmatpush3.bf16.msra.mxu0 %v362_v37  ;;  %387 = vmatpush3.bf16.msra.mxu1 %v362_v37 }
  0x42   :  { %367 = vmatprep.subr.bf16.mxu0 %v366_v40  ;;  %380 = vmatprep.subr.bf16.mxu1 %v366_v40 }
  0x45   :  { %369 = vmatpush3.bf16.msra.mxu0 %v366_v40  ;;  %388 = vmatpush3.bf16.msra.mxu1 %v366_v40 }
  0x46   :  { %371 = vmatprep.subr.bf16.mxu0 %v370_v43  ;;  %381 = vmatprep.subr.bf16.mxu1 %v370_v43 }
  0x49   :  { %373 = vmatpush3.bf16.msra.mxu0 %v370_v43  ;;  %389 = vmatpush3.bf16.msra.mxu1 %v370_v43 }
  0xb4   :  { %v62_v10 = vpop.xlane.xlu0 %61  ;;  %v64_v11 = vpop.xlane.xlu1 %63 }
  0xb5   :  { %v70_v12 = vmul.f32 0.0078125, %v62_v10  ;;  %v71_v13 = vmul.f32 0.0078125, %v64_v11  ;;  %v283_v10 = vld [vmem:[%s586_s2] ss:$0 sm:$0xff] }
  0xb7   :  { %v540_v14 = vsub.f32 %v57_v0, %v70_v12  ;;  %v542_v15 = vsub.f32 %v58_v1, %v71_v13 }
  0xb8   :  { %v66_v16 = vpop.xlane.xlu0 %65  ;;  %v68_v17 = vpop.xlane.xlu1 %67 }
  0xb9   :  { %v72_v18 = vmul.f32 0.0078125, %v66_v16  ;;  %v78_v19 = vmul.f32 %v540_v14, %v540_v14  ;;  %v73_v20 = vmul.f32 0.0078125, %v68_v17  ;;  %v79_v23 = vmul.f32 %v542_v15, %v542_v15 }
  0xbb   :  { %v546_v21 = vsub.f32 %v59_v2, %v72_v18  ;;  %82 = vadd.xlane.f32.xlu0 %v78_v19  ;;  %v548_v22 = vsub.f32 %v60_v3, %v73_v20 }
  0xbd   :  { %v80_v24 = vmul.f32 %v546_v21, %v546_v21  ;;  %v81_v25 = vmul.f32 %v548_v22, %v548_v22 }
  0xbf   :  { %84 = vadd.xlane.f32.xlu0 %v79_v23  ;;  %86 = vadd.xlane.f32.xlu1 %v80_v24 }
  0xc3   :  { %88 = vadd.xlane.f32.xlu1 %v81_v25 }
 0x148   :  { %v83_v44 = vpop.xlane.xlu0 %82 }
 0x149   :  { %v90_v45 = vmul.f32 0.0078125, %v83_v44 }
 0x14b   :  { %v94_v46 = vadd.f32 1e-05, %v90_v45 }
 0x14c   :  { %v87_v47 = vpop.xlane.xlu1 %86  ;;  %v85_v48 = vpop.xlane.xlu0 %84 }
 0x14d   :  { %395 = vrsqrt.f32 %v94_v46  ;;  %v92_v49 = vmul.f32 0.0078125, %v87_v47  ;;  %v91_v50 = vmul.f32 0.0078125, %v85_v48 }
 0x14f   :  { %v96_v51 = vadd.f32 1e-05, %v92_v49  ;;  %v95_v52 = vadd.f32 1e-05, %v91_v50 }
 0x150   :  { %v89_v53 = vpop.xlane.xlu1 %88 }
 0x151   :  { %397 = vrsqrt.f32 %v96_v51  ;;  %v93_v54 = vmul.f32 0.0078125, %v89_v53 }
 0x152   :  { %399 = vrsqrt.f32 %v95_v52 }
 0x153   :  { %v97_v55 = vadd.f32 1e-05, %v93_v54 }
 0x155   :  { %401 = vrsqrt.f32 %v97_v55 }
 0x157   :  { %v396_v56 = vpop.eup %395 }
 0x158   :  { %v102_v58 = vmul.f32 %v396_v56, %v540_v14 }
 0x15a   :  { %v113_v60 = vmul.f32 %v281_v57, %v102_v58 }
 0x15b   :  { %v398_v61 = vpop.eup %397 }
 0x15c   :  { %v400_v62 = vpop.eup %399  ;;  %v124_v63 = vadd.f32 %v282_v59, %v113_v60  ;;  %v104_v0 = vmul.f32 %v398_v61, %v546_v21 }
 0x15d   :  { %v103_v1 = vmul.f32 %v400_v62, %v542_v15 }
 0x15e   :  { %336 = vmatprep.mubr.f32.mxu0 %v124_v63  ;;  %v115_v2 = vmul.f32 %v281_v57, %v104_v0 }
 0x15f   :  { %v402_v3 = vpop.eup %401  ;;  %v114_v4 = vmul.f32 %v281_v57, %v103_v1 }
 0x160   :  { %v126_v5 = vadd.f32 %v282_v59, %v115_v2  ;;  %v105_v6 = vmul.f32 %v402_v3, %v548_v22 }
 0x161   :  { %v125_v7 = vadd.f32 %v282_v59, %v114_v4 }
 0x162   :  { %339 = vmatprep.mubr.f32.mxu1 %v126_v5  ;;  %v116_v8 = vmul.f32 %v281_v57, %v105_v6 }
 0x163   :  { %337 = vmatmul.mubr.f32.vlgmr.msra.gmra.mrb[0].mxu0 %v125_v7 }
 0x164   :  { %v127_v9 = vadd.f32 %v282_v59, %v116_v8 }
 0x166   :  { %340 = vmatmul.mubr.f32.vlgmr.msra.gmra.mrb[0].mxu1 %v127_v9 }
 0x236   :  { %v338_v11 = vpop.f32.mrb[0].mxu0 }
 0x237   :  { %v256_v12 = vadd.f32 %v338_v11, %v283_v10  ;;  %v214_v13 = vpop.f32.mrb[1].mxu0 }
 0x238   :  { %v255_v14 = vadd.f32 %v283_v10, %v214_v13 }
 0x239   :  { %260 = vst [vmem:[#allocation8 + $0x8] sm:$0xff] %v256_v12  ;;  %v341_v15 = vpop.f32.mrb[0].mxu1 }
 0x23a   :  { %259 = vst [vmem:[#allocation8] sm:$0xff] %v255_v14  ;;  %v258_v16 = vadd.f32 %v341_v15, %v283_v10  ;;  %v224_v17 = vpop.f32.mrb[1].mxu1 }
 0x23b   :  { %v257_v18 = vadd.f32 %v283_v10, %v224_v17 }
 0x23c   :  { %262 = vst [vmem:[#allocation8 + $0x18] sm:$0xff] %v258_v16 }
 0x23d   :  { %261 = vst [vmem:[#allocation8 + $0x10] sm:$0xff] %v257_v18 }
 0x23e   :  { %458 = shalt.err (!%p455_p6)
}
 0x23f   :  { %s459_s25 = scalar_lea.hbm %s589_s5, 512 }
 0x240   :  { %p460_p7 = scmp.ne.s32.totalorder %s589_s5, %s459_s25  ;;  %p463_p8 = scmp.lt.u32.totalorder %s459_s25, %s589_s5 }
 0x242   :  { %p465_p9 = pnand %p463_p8, %p460_p7 }
 0x244   :  { %468 = shalt.err (!%p465_p9)
}
 0x245   :  { %274 = dma.vmem_to_hbm [thread:$0]  %s269_s22, 512, %s589_s5, [#allocation5], %s476_s28, %s476_s28, %s477_s29  }
 0x246   :  { %473 = dma.done.wait [#allocation5], 512  }
 0x247   :  { %474 = vsyncadd [#allocation5], 4294966784 }
 0x248   :  { %278 = vsyncpa [#allocation4], 1 }
 0x249   :  { %279 = vsyncpa [#allocation7], 1 }
 0x24a   :  { %280 = vsyncpa [#allocation5], 1 }

</bundles_post_ra>
